<compile_context>
chip_gen: v7x
topology: tpu7x:2x2x1
jax: 0.10.0
libtpu: 0.0.40
codegen_flags: <defaults>
</compile_context>

<pallas_src>
import math

import jax
import jax.numpy as jnp
from jax.experimental import pallas as pl
from jax.experimental.pallas import tpu as pltpu

EPS = 1e-6  # matches LayerNorm(eps=1e-06)

_COMPILER_PARAMS = pltpu.CompilerParams(
    dimension_semantics=("parallel",),       # row-tile axis shards across TCs (v7x)
    vmem_limit_bytes=48 * 1024 * 1024,       # stay under v7x's 64 MiB physical VMEM
)


def _pick_row_tile(m, max_tile=256):
    """Largest multiple-of-8 divisor of m that is <= max_tile, preferring a
    choice that leaves >= 2 grid steps (so the parallel row axis can shard
    across v7x's two TensorCores).  Falls back to the full extent."""
    fallback = m
    for t in (512, 256, 128, 64, 32, 16, 8):
        if t <= max_tile and m % t == 0:
            if m // t >= 2:
                return t
            fallback = min(fallback, t)
    return fallback


def _residual_layernorm_epilogue(x_f32, s_f32, a, b):
    """f32 epilogue shared by both kernels:  x + a*(s-mean)/(std+eps) + b.

    The divide is per-row ([TM,1]); the per-element path is multiplies only.
    """
    d = s_f32.shape[-1]
    mean = jnp.sum(s_f32, axis=-1, keepdims=True) * (1.0 / d)
    diff = s_f32 - mean
    var = jnp.sum(diff * diff, axis=-1, keepdims=True) * (1.0 / (d - 1))
    inv = 1.0 / (jnp.sqrt(var) + EPS)            # [TM,1] -> one divide per row
    return x_f32 + (diff * inv) * a + b


# ----------------------------- Pallas kernels ------------------------------ #

def _linear_sublayer_kernel(x_ref, w_ref, c_ref, a_ref, b_ref, o_ref):
    """One [TM, D] row tile of:  out = x + LayerNorm(x @ W + c).

    x/W are bf16 MXU inputs; accumulation and all epilogue math are f32.
    """
    x = x_ref[...]                                                     # [TM, D]
    s = jnp.dot(x, w_ref[...], preferred_element_type=jnp.float32)     # MXU, f32 acc
    s = s + c_ref[...]                                                 # bias (f32)
    out = _residual_layernorm_epilogue(x.astype(jnp.float32), s,
                                       a_ref[...], b_ref[...])
    o_ref[...] = out.astype(o_ref.dtype)


def _residual_norm_kernel(x_ref, s_ref, a_ref, b_ref, o_ref):
    """One [TM, D] row tile of:  out = x + LayerNorm(s)."""
    out = _residual_layernorm_epilogue(x_ref[...].astype(jnp.float32),
                                       s_ref[...].astype(jnp.float32),
                                       a_ref[...], b_ref[...])
    o_ref[...] = out.astype(o_ref.dtype)


# ------------------------------- wrappers ----------------------------------- #

def sublayer_connection_linear(x, w, c, a, b, *, row_tile=None,
                               out_dtype=jnp.float32):
    """SublayerConnection with a Linear(D->D) sublayer, fully fused in one
    pallas_call per row tile:  out = x + LayerNorm(x @ W + c).

    x: [B, S, D] (bf16 or f32); w: [D, D]; c/a/b: [D].
    """
    B, S, D = x.shape
    M = B * S
    tm = row_tile or _pick_row_tile(M)
    assert M % tm == 0
    out = pl.pallas_call(
        _linear_sublayer_kernel,
        grid=(M // tm,),
        in_specs=[
            pl.BlockSpec((tm, D), lambda i: (i, 0)),   # x row tile (pipelined)
            pl.BlockSpec((D, D), lambda i: (0, 0)),    # W: VMEM-resident across tiles
            pl.BlockSpec((1, D), lambda i: (0, 0)),    # linear bias
            pl.BlockSpec((1, D), lambda i: (0, 0)),    # a_2
            pl.BlockSpec((1, D), lambda i: (0, 0)),    # b_2
        ],
        out_specs=pl.BlockSpec((tm, D), lambda i: (i, 0)),
        out_shape=jax.ShapeDtypeStruct((M, D), out_dtype),
        compiler_params=_COMPILER_PARAMS,
    )(
        x.reshape(M, D),
        w,
        c.reshape(1, D).astype(jnp.float32),
        a.reshape(1, D).astype(jnp.float32),
        b.reshape(1, D).astype(jnp.float32),
    )
    return out.reshape(B, S, D)


def residual_layer_norm(x, s, a, b, *, row_tile=None, out_dtype=jnp.float32):
    """Fused epilogue:  out = x + LayerNorm(s)  in a single pallas_call."""
    B, S, D = x.shape
    M = B * S
    tm = row_tile or _pick_row_tile(M)
    assert M % tm == 0
    out = pl.pallas_call(
        _residual_norm_kernel,
        grid=(M // tm,),
        in_specs=[
            pl.BlockSpec((tm, D), lambda i: (i, 0)),
            pl.BlockSpec((tm, D), lambda i: (i, 0)),
            pl.BlockSpec((1, D), lambda i: (0, 0)),
            pl.BlockSpec((1, D), lambda i: (0, 0)),
        ],
        out_specs=pl.BlockSpec((tm, D), lambda i: (i, 0)),
        out_shape=jax.ShapeDtypeStruct((M, D), out_dtype),
        compiler_params=_COMPILER_PARAMS,
    )(
        x.reshape(M, D),
        s.reshape(M, D),
        a.reshape(1, D).astype(jnp.float32),
        b.reshape(1, D).astype(jnp.float32),
    )
    return out.reshape(B, S, D)


def sublayer_connection(x, sublayer_fn, a, b):
    """Generic SublayerConnection.forward(x, sublayer):
        out = x + norm(dropout(sublayer(x)))
    dropout is a no-op (eval / p == 0).  The arbitrary `sublayer_fn` runs in
    plain JAX; the residual + LayerNorm epilogue is one fused Pallas call.
    """
    # TODO(synk): training-mode dropout (p > 0) with RNG is not implemented.
    s = sublayer_fn(x)
    return residual_layer_norm(x, s, a, b)


# --------------------------- pure-JAX references ---------------------------- #

def _ref_layernorm(s, a, b):
    mean = s.mean(-1, keepdims=True)
    diff = s - mean
    var = jnp.sum(diff * diff, -1, keepdims=True) / (s.shape[-1] - 1)
    return a * diff / (jnp.sqrt(var) + EPS) + b


def _ref_sublayer_connection(x, s, a, b):
    return x + _ref_layernorm(s, a, b)


# ----------------------------------- main ----------------------------------- #

if __name__ == "__main__":
    # Small but lane-dense shapes: D multiple of 128 -> unmasked full-lane
    # stores; M = B*S = 256 rows -> two parallel row tiles of 128.
    B, S, D = 2, 128, 128

    key = jax.random.PRNGKey(0)
    kx, kw, kc, ka, kb = jax.random.split(key, 5)
    x_f32 = jax.random.normal(kx, (B, S, D), jnp.float32)
    a = 1.0 + 0.1 * jax.random.normal(ka, (D,), jnp.float32)   # a_2
    b = 0.1 * jax.random.normal(kb, (D,), jnp.float32)         # b_2

    # ---- path 1: Linear(D->D) sublayer, fully fused (matmul+bias+norm+residual)
    w = (jax.random.normal(kw, (D, D), jnp.float32) / math.sqrt(D)).astype(jnp.bfloat16)
    c = 0.1 * jax.random.normal(kc, (D,), jnp.float32)
    x_bf16 = x_f32.astype(jnp.bfloat16)

    out1 = jax.block_until_ready(sublayer_connection_linear(x_bf16, w, c, a, b))

    x32 = x_bf16.astype(jnp.float32)   # reference uses the same bf16-valued inputs
    s_ref = jnp.dot(x32, w.astype(jnp.float32),
                    precision=jax.lax.Precision.HIGHEST) + c
    ref1 = _ref_sublayer_connection(x32, s_ref, a, b)
    err1 = float(jnp.max(jnp.abs(out1 - ref1)))
    assert out1.shape == (B, S, D)
    assert jnp.allclose(out1, ref1, atol=2e-3, rtol=2e-3), err1

    # ---- path 2: arbitrary sublayer callable, fused residual + LayerNorm
    sub_fn = lambda t: 0.5 * jnp.tanh(t)
    out2 = jax.block_until_ready(sublayer_connection(x_f32, sub_fn, a, b))
    ref2 = _ref_sublayer_connection(x_f32, sub_fn(x_f32), a, b)
    err2 = float(jnp.max(jnp.abs(out2 - ref2)))
    assert out2.shape == (B, S, D)
    assert jnp.allclose(out2, ref2, atol=1e-4, rtol=1e-4), err2

    print("KERNEL_OK")
</pallas_src>

<mosaic_0001>
module attributes {stable_mosaic.version = 11 : i64} {
  func.func @_linear_sublayer_kernel(%arg0: i32, %arg1: memref<128x128xbf16, #tpu.memory_space<vmem>>, %arg2: memref<128x128xbf16, #tpu.memory_space<vmem>>, %arg3: memref<1x128xf32, #tpu.memory_space<vmem>>, %arg4: memref<1x128xf32, #tpu.memory_space<vmem>>, %arg5: memref<1x128xf32, #tpu.memory_space<vmem>>, %arg6: memref<128x128xf32, #tpu.memory_space<vmem>>) attributes {dimension_semantics = [#tpu.dimension_semantics<parallel>], iteration_bounds = array<i64: 2>, scalar_prefetch = 0 : i64, scratch_operands = 0 : i64, tpu.core_type = #tpu.core_type<tc>, window_params = [{transform_indices = @transform_0, window_bounds = array<i64: 128, 128>}, {pipeline_mode = #tpu.pipeline_mode<synchronous>, transform_indices = @transform_1, window_bounds = array<i64: 128, 128>}, {pipeline_mode = #tpu.pipeline_mode<synchronous>, transform_indices = @transform_2, window_bounds = array<i64: 1, 128>}, {pipeline_mode = #tpu.pipeline_mode<synchronous>, transform_indices = @transform_3, window_bounds = array<i64: 1, 128>}, {pipeline_mode = #tpu.pipeline_mode<synchronous>, transform_indices = @transform_4, window_bounds = array<i64: 1, 128>}, {transform_indices = @transform_5, window_bounds = array<i64: 128, 128>}]} {
    %c0 = arith.constant 0 : index
    %c0_0 = arith.constant 0 : index
    %0 = vector.load %arg1[%c0, %c0_0] : memref<128x128xbf16, #tpu.memory_space<vmem>>, vector<128x128xbf16>
    %c0_1 = arith.constant 0 : index
    %c0_2 = arith.constant 0 : index
    %1 = vector.load %arg2[%c0_1, %c0_2] : memref<128x128xbf16, #tpu.memory_space<vmem>>, vector<128x128xbf16>
    %cst = arith.constant dense<0.000000e+00> : vector<128x128xf32>
    %2 = tpu.matmul %0, %1, %cst {dimension_numbers = #tpu.dot_dimension_numbers<[1], [0], [0], [1], [0, 0, 1, 1], [], []>} : vector<128x128xbf16>, vector<128x128xbf16>, vector<128x128xf32> -> vector<128x128xf32>
    %c0_3 = arith.constant 0 : index
    %c0_4 = arith.constant 0 : index
    %3 = vector.load %arg3[%c0_3, %c0_4] : memref<1x128xf32, #tpu.memory_space<vmem>>, vector<1x128xf32>
    %4 = vector.broadcast %3 : vector<1x128xf32> to vector<128x128xf32>
    %5 = arith.addf %2, %4 : vector<128x128xf32>
    %6 = arith.extf %0 : vector<128x128xbf16> to vector<128x128xf32>
    %c0_5 = arith.constant 0 : index
    %c0_6 = arith.constant 0 : index
    %7 = vector.load %arg4[%c0_5, %c0_6] : memref<1x128xf32, #tpu.memory_space<vmem>>, vector<1x128xf32>
    %c0_7 = arith.constant 0 : index
    %c0_8 = arith.constant 0 : index
    %8 = vector.load %arg5[%c0_7, %c0_8] : memref<1x128xf32, #tpu.memory_space<vmem>>, vector<1x128xf32>
    %cst_9 = arith.constant dense<0.000000e+00> : vector<128xf32>
    %9 = vector.multi_reduction <add>, %5, %cst_9 [1] : vector<128x128xf32> to vector<128xf32>
    %10 = vector.shape_cast %9 : vector<128xf32> to vector<128x1xf32>
    %cst_10 = arith.constant 7.812500e-03 : f32
    %11 = vector.broadcast %cst_10 : f32 to vector<128x1xf32>
    %12 = arith.mulf %10, %11 : vector<128x1xf32>
    %13 = vector.broadcast %12 : vector<128x1xf32> to vector<128x128xf32>
    %14 = arith.subf %5, %13 : vector<128x128xf32>
    %15 = arith.mulf %14, %14 : vector<128x128xf32>
    %cst_11 = arith.constant dense<0.000000e+00> : vector<128xf32>
    %16 = vector.multi_reduction <add>, %15, %cst_11 [1] : vector<128x128xf32> to vector<128xf32>
    %17 = vector.shape_cast %16 : vector<128xf32> to vector<128x1xf32>
    %cst_12 = arith.constant 0.00787401571 : f32
    %18 = vector.broadcast %cst_12 : f32 to vector<128x1xf32>
    %19 = arith.mulf %17, %18 : vector<128x1xf32>
    %20 = math.sqrt %19 : vector<128x1xf32>
    %cst_13 = arith.constant 9.99999997E-7 : f32
    %21 = vector.broadcast %cst_13 : f32 to vector<128x1xf32>
    %22 = arith.addf %20, %21 : vector<128x1xf32>
    %cst_14 = arith.constant 1.000000e+00 : f32
    %23 = vector.broadcast %cst_14 : f32 to vector<128x1xf32>
    %24 = arith.divf %23, %22 : vector<128x1xf32>
    %25 = vector.broadcast %24 : vector<128x1xf32> to vector<128x128xf32>
    %26 = arith.mulf %14, %25 : vector<128x128xf32>
    %27 = vector.broadcast %7 : vector<1x128xf32> to vector<128x128xf32>
    %28 = arith.mulf %26, %27 : vector<128x128xf32>
    %29 = arith.addf %6, %28 : vector<128x128xf32>
    %30 = vector.broadcast %8 : vector<1x128xf32> to vector<128x128xf32>
    %31 = arith.addf %29, %30 : vector<128x128xf32>
    %c0_15 = arith.constant 0 : index
    %c0_16 = arith.constant 0 : index
    %32 = vector.load %arg6[%c0_15, %c0_16] : memref<128x128xf32, #tpu.memory_space<vmem>>, vector<128x128xf32>
    tpu.vector_store %arg6[%c0_15, %c0_16], %31 {strides = array<i32>} : memref<128x128xf32, #tpu.memory_space<vmem>>, vector<128x128xf32>,
    return
  }
  func.func @transform_0(%arg0: i32) -> (i32, i32) {
    %c0_i32 = arith.constant 0 : i32
    %c0_i32_0 = arith.constant 0 : i32
    return %arg0, %c0_i32 : i32, i32
  }
  func.func @transform_1(%arg0: i32) -> (i32, i32) {
    %c0_i32 = arith.constant 0 : i32
    %c0_i32_0 = arith.constant 0 : i32
    %c0_i32_1 = arith.constant 0 : i32
    return %c0_i32, %c0_i32_0 : i32, i32
  }
  func.func @transform_2(%arg0: i32) -> (i32, i32) {
    %c0_i32 = arith.constant 0 : i32
    %c0_i32_0 = arith.constant 0 : i32
    %c0_i32_1 = arith.constant 0 : i32
    return %c0_i32, %c0_i32_0 : i32, i32
  }
  func.func @transform_3(%arg0: i32) -> (i32, i32) {
    %c0_i32 = arith.constant 0 : i32
    %c0_i32_0 = arith.constant 0 : i32
    %c0_i32_1 = arith.constant 0 : i32
    return %c0_i32, %c0_i32_0 : i32, i32
  }
  func.func @transform_4(%arg0: i32) -> (i32, i32) {
    %c0_i32 = arith.constant 0 : i32
    %c0_i32_0 = arith.constant 0 : i32
    %c0_i32_1 = arith.constant 0 : i32
    return %c0_i32, %c0_i32_0 : i32, i32
  }
  func.func @transform_5(%arg0: i32) -> (i32, i32) {
    %c0_i32 = arith.constant 0 : i32
    %c0_i32_0 = arith.constant 0 : i32
    return %arg0, %c0_i32 : i32, i32
  }
}

</mosaic_0001>

<bundles_post_ra>
// kernel: tpu_custom_call.1
= control target key start
LH: loop header
LB: loop body
LE: loop exit
PB: predicated region body
PF: predicated region fallthrough
CT: control target
= control target key end

     0   :  { %10 = vsyncpa [#allocation3], 0  ;;  %s2000_s0 = inlined_call_operand.hbm [shape: bf16[256,128], index: 0, kind: input, shape index: {}]   ;;  %s2001_s1 = inlined_call_operand.hbm [shape: bf16[128,128], index: 1, kind: input, shape index: {}]   ;;  %s2002_s2 = inlined_call_operand.vmem [shape: f32[1,128], index: 2, kind: input, shape index: {}]   ;;  %s2003_s3 = inlined_call_operand.vmem [shape: f32[1,128], index: 3, kind: input, shape index: {}]   ;;  %s2004_s4 = inlined_call_operand.vmem [shape: f32[1,128], index: 4, kind: input, shape index: {}]   ;;  %s2005_s5 = inlined_call_operand.hbm [shape: f32[256,128], index: 5, kind: output, shape index: {}]  }
   0x1   :  { %12 = vsyncpa [#allocation3 + $0x1], 0 }
   0x2   :  { %13 = vsyncpa [#allocation6], 0 }
   0x3   :  { %14 = vsyncpa [#allocation4], 0 }
   0x4   :  { %16 = vsyncpa [#allocation4 + $0x1], 0  ;;  %s1405_s18 = smov 0   ;;  %s1407_s19 = smov 0  }
   0x5   :  { %s1409_s20 = smov 0   ;;  %s1411_s21 = smov 0  }
   0x6 LB: > { %s1426_s22 = sadd.s32 4294967295, %s1366_s21   ;;  %s988_s23 = sadd.s32 4294967294, %s1366_s21   ;;  %s1366_s21 = sphi %s1411_s21, %s2025_s21   ;;  %s1362_s20 = sphi %s1409_s20, %s2024_s20   ;;  %s1358_s19 = sphi %s1407_s19, %s2023_s19   ;;  %s1354_s18 = sphi %s1405_s18, %s2022_s18  }
   0x7   : > { %p42_p0 = scmp.ne.s32.totalorder %s1358_s19, %s1354_s18  ;;  %p2006_p1 = scmp.eq.s32.totalorder %s1426_s22, 0 }
   0x8   : > { %p156_p3 = scmp.eq.s32.totalorder %s988_s23, 1  ;;  %p989_p5 = scmp.ge.s32.totalorder %s1366_s21, 1 }
   0x9   : > { %p1435_p4 = por %p2006_p1, %p42_p0  ;;  %p163_p7 = scmp.lt.s32.totalorder %s1366_s21, 3 }
   0xa   : > { %p1440_p6 = por %p156_p3, %p42_p0  ;;  %s1368_s27 = smov [#allocation5]  }
   0xb   : > { %s2009_s24 = scalar_select %p1435_p4, 1, 0 }
   0xc   : > { %s2010_s25 = scalar_select %p1440_p6, 1, 0 }
   0xd   : > { %p1445_p8 = pnand %p989_p5, %p163_p7  ;;  %s175_s28 = sshll.u32 %s1368_s27, 4  ;;  %s1449_s28 = int_to_ptr.vmem [resolvable:$true] %s175_s28 }
   0xe   : > { %s1461_s30 = sadd.s32 1, %s1366_s21   ;;  %s29_s6 = sadd.s32 1, %s1362_s20 }
   0xf   : > { %s2011_s26 = scalar_select %p1445_p8, 1, 0 }
  0x10   : > { %p1097_p9 = pneg %p1445_p8  ;;  %s26_s7 = ssub.s32 %s1366_s21, %s1461_s30 }
  0x11   : > { %s1238_s10 = scalar_lea.hbm %s2001_s1, 1024 }
  0x12   : > { %p1456_p11 = pnand %p1097_p9, %p2006_p1  ;;  %p1239_p12 = scmp.ne.s32.totalorder %s2001_s1, %s1238_s10 }
  0x13   : > { %p1245_p5 = scmp.lt.u32.totalorder %s1238_s10, %s2001_s1 }
  0x14   : > { %p1240_p13 = pneg %p1456_p11 }
  0x16   : > { %p1241_p0 = pnand %p1240_p13, %p1239_p12 }
  0x18   : > { %p1242_p3 = pneg %p1241_p0 }
  0x1a   : > { %p1247_p7 = pnand %p1245_p5, %p1242_p3 }
  0x1c   : > { %1250 = shalt.err (!%p1247_p7)
}
  0x1d   : > { %s1251_s15 = scalar_lea.vmem %s1449_s28, 1024  ;;  %p1259_p2 = scmp.lt.s32.totalorder %s1449_s28, %s1449_s28 }
  0x1e   : > { %p1252_p9 = scmp.ne.s32.totalorder %s1449_s28, %s1251_s15  ;;  %p1260_p6 = scmp.lt.s32.totalorder %s1251_s15, %s1251_s15 }
  0x20   : > { %p1254_p10 = pnand %p1252_p9, %p1240_p13  ;;  %p1261_p4 = por %p1260_p6, %p1259_p2 }
  0x22   : > { %p1255_p1 = pneg %p1254_p10 }
  0x24   : > { %p1262_p8 = pnand %p1261_p4, %p1255_p1 }
  0x26   : > { %1265 = shalt.err (!%p1262_p8)
}
  0x27   : > { %s1369_s16 = smov 64   ;;  %s1370_s17 = smov 4  }
  0x28   : > { %1100 = dma.hbm_to_vmem [thread:$0]  (!%p1456_p11), %s2001_s1, 1024, %s1449_s28, [#allocation6], %s1369_s16, %s1369_s16, %s1370_s17  }
  0x29   : > { %p27_p1 = scmp.eq.s32.totalorder %s26_s7, 0  ;;  %p36_p2 = scmp.ne.s32.totalorder %s1362_s20, %s1358_s19 }
  0x2a   : > { %p37_p4 = scmp.eq.s32.totalorder %s1366_s21, 0  ;;  %p1110_p6 = scmp.lt.s32.totalorder %s1366_s21, 2 }
  0x2b   : > { %s1495_s8 = scalar_select %p27_p1, %s1362_s20, %s29_s6  }
  0x2c   : > { %p38_p8 = por %p37_p4, %p36_p2  ;;  %p2013_p10 = scmp.eq.s32.totalorder %s1426_s22, 1 }
  0x2d   : > { %s198_s29 = sand.u32 1, %s1362_s20   ;;  %s1023_s10 = sshll.u32 %s1366_s21, 10 }
  0x2e   : > { %p1499_p12 = por %p2013_p10, %p36_p2  ;;  %s992_s11 = sshll.u32 %s198_s29, 6 }
  0x2f   : > { %s1508_s14 = scalar_lea.hbm %s2000_s0, %s1023_s10  ;;  %s202_s28 = scalar_lea.vmem [#allocation2], %s992_s11 }
  0x30   : > { %s209_s6 = sshll.u32 %s202_s28, 4  ;;  %p1510_p11 = pnand %p1110_p6, %p38_p8  ;;  %s1514_s6 = int_to_ptr.vmem [resolvable:$true] %s209_s6 }
  0x31   : > { %s1516_s15 = scalar_lea.sflag [#allocation3], %s198_s29  ;;  %s1266_s23 = scalar_lea.hbm %s1508_s14, 1024 }
  0x32   : > { %p1267_p13 = scmp.ne.s32.totalorder %s1508_s14, %s1266_s23  ;;  %p1268_p0 = pneg %p1510_p11 }
  0x33   : > { %s1271_s11 = scalar_lea.hbm %s2000_s0, 2048  ;;  %p1272_p7 = scmp.lt.u32.totalorder %s1508_s14, %s2000_s0 }
  0x34   : > { %p1269_p3 = pnand %p1268_p0, %p1267_p13  ;;  %p1273_p9 = scmp.lt.u32.totalorder %s1271_s11, %s1266_s23 }
  0x35   : > { %p1275_p2 = scmp.lt.u32.totalorder %s1266_s23, %s1508_s14 }
  0x36   : > { %p1270_p5 = pneg %p1269_p3  ;;  %p1274_p1 = por %p1273_p9, %p1272_p7 }
  0x38   : > { %p1276_p4 = por %p1275_p2, %p1274_p1 }
  0x3a   : > { %p1277_p6 = pnand %p1276_p4, %p1270_p5 }
  0x3c   : > { %1280 = shalt.err (!%p1277_p6)
}
  0x3d   : > { %s1281_s29 = scalar_lea.vmem %s1514_s6, 1024  ;;  %s1371_s28 = smov [#allocation2]  }
  0x3e   : > { %p1282_p8 = scmp.ne.s32.totalorder %s1514_s6, %s1281_s29  ;;  %s1286_s27 = sshll.u32 %s1371_s28, 4  ;;  %s1287_s27 = int_to_ptr.vmem [resolvable:$false] %s1286_s27 }
  0x3f   : > { %s1288_s10 = scalar_lea.vmem %s1287_s27, 2048  ;;  %p1289_p3 = scmp.lt.s32.totalorder %s1514_s6, %s1287_s27 }
  0x40   : > { %p1284_p10 = pnand %p1282_p8, %p1268_p0  ;;  %p1290_p7 = scmp.lt.s32.totalorder %s1288_s10, %s1281_s29 }
  0x42   : > { %p1285_p13 = pneg %p1284_p10  ;;  %p1291_p9 = por %p1290_p7, %p1289_p3 }
  0x44   : > { %p1292_p1 = pnand %p1291_p9, %p1285_p13 }
  0x46   : > { %1295 = shalt.err (!%p1292_p1)
}
  0x47   : > { %1104 = dma.hbm_to_vmem [thread:$0]  (!%p1510_p11), %s1508_s14, 1024, %s1514_s6, %s1516_s15, %s1369_s16, %s1369_s16, %s1370_s17  }
  0x48   : > { %p2016_p0 = scmp.ne.s32.totalorder %s2011_s26, 0 }
  0x49   : > { %s1550_s23 = sand.u32 (!%p2016_p0), 1, %s1358_s19   ;;  %p2017_p5 = scmp.ne.s32.totalorder (!%p2016_p0), %s2009_s24, 0 }
  0x4a   : > { %221 = sbr.rel (%p2016_p0) target bundleno = 727 (0x2d7), region = 40  ;;  %s996_s11 = sshll.u32 (!%p2016_p0), %s1550_s23, 6 }
  0x4b   : > { %s224_s12 = scalar_lea.sflag (!%p2016_p0), [#allocation3], %s1550_s23  ;;  %s1554_s13 = scalar_lea.vmem (!%p2016_p0), [#allocation2], %s996_s11 }
  0x51   : > { %1341 = dma.done.wait (%p2017_p5), %s224_s12, 1024  }
  0x52   : > { %1343 = vsyncadd (%p2017_p5), %s224_s12, 4294966272  ;;  %p2018_p11 = scmp.eq.s32.totalorder %s1426_s22, 0 }
  0x54   : > { %1345 = dma.done.wait (%p2018_p11), [#allocation6], 1024   ;;  %p2019_p2 = pmov %p2018_p11 }
  0x55   : > { %v1150_v0 = vld [vmem:[#allocation5] sm:$0xff]   ;;  %v1151_v1 = vld [vmem:[#allocation5 + $0x8] sm:$0xff]   ;;  %v1152_v2 = vld [vmem:[#allocation5 + $0x10] sm:$0xff]   ;;  %s998_s14 = sshll.u32 %s1550_s23, 7  ;;  %s1024_s29 = sshll.u32 %s1426_s22, 11 }
  0x56   : > { %1347 = vsyncadd (%p2019_p2), [#allocation6], 4294966272  ;;  %1041 = vmatprep.subr.bf16.mxu0 %v1150_v0  ;;  %1073 = vmatprep.subr.bf16.mxu1 %v1150_v0  ;;  %v1153_v3 = vld [vmem:[#allocation5 + $0x18] sm:$0xff]   ;;  %v1565_v4 = vld [vmem:[%s1554_s13] sm:$0xff]   ;;  %s1823_s15 = scalar_lea.vmem [#allocation7], %s998_s14  ;;  %s1952_s11 = scalar_lea.hbm %s2005_s5, %s1024_s29 }
  0x57   : > { %1042 = vmatpush3.bf16.msra.mxu0 %v1150_v0  ;;  %1081 = vmatpush3.bf16.msra.mxu1 %v1150_v0  ;;  %v1568_v5 = vld [vmem:[%s1554_s13 + $0x20] sm:$0xff]   ;;  %v1155_v7 = vld [vmem:[#allocation5 + $0x28] sm:$0xff]   ;;  %v1156_v8 = vld [vmem:[#allocation5 + $0x30] sm:$0xff]   ;;  %s905_s28 = sshll.u32 %s1823_s15, 4  ;;  %s892_s12 = scalar_lea.sflag [#allocation4], %s1550_s23  ;;  %s1954_s28 = int_to_ptr.vmem [resolvable:$true] %s905_s28 }
  0x58   : > { %1043 = vmatprep.subr.bf16.mxu0 %v1151_v1  ;;  %1074 = vmatprep.subr.bf16.mxu1 %v1151_v1  ;;  %v1154_v6 = vld [vmem:[#allocation5 + $0x20] sm:$0xff]   ;;  %v1157_v9 = vld [vmem:[#allocation5 + $0x38] sm:$0xff]   ;;  %v1573_v10 = vld [vmem:[%s1554_s13 + $0x8] sm:$0xff]   ;;  %s1372_s22 = smov [#allocation7]  }
  0x59   : > { %1057 = vmatprep.mubr.bf16.mxu0 %v1565_v4  ;;  %1065 = vmatprep.mubr.bf16.mxu1 %v1568_v5  ;;  %v1576_v11 = vld [vmem:[%s1554_s13 + $0x28] sm:$0xff]   ;;  %v1579_v12 = vld [vmem:[%s1554_s13 + $0x10] sm:$0xff]   ;;  %v1588_v14 = vld [vmem:[%s1554_s13 + $0x18] sm:$0xff]   ;;  %s1300_s24 = sshll.u32 %s1372_s22, 4  ;;  %s1301_s24 = int_to_ptr.vmem [resolvable:$false] %s1300_s24 }
  0x5a   : > { %v1582_v13 = vld [vmem:[%s1554_s13 + $0x30] sm:$0xff]   ;;  %v1592_v15 = vld [vmem:[%s1554_s13 + $0x38] sm:$0xff]   ;;  %v999_v16 = vld [vmem:[%s2002_s2] ss:$0 sm:$0xff]  ;;  %s1296_s13 = scalar_lea.vmem %s1954_s28, 2048  ;;  %s1302_s26 = scalar_lea.vmem %s1301_s24, 4096 }
  0x5b   : > { %1044 = vmatpush3.bf16.msra.mxu0 %v1151_v1  ;;  %1082 = vmatpush3.bf16.msra.mxu1 %v1151_v1  ;;  %p1297_p4 = scmp.ne.s32.totalorder %s1954_s28, %s1296_s13  ;;  %p1303_p10 = scmp.lt.s32.totalorder %s1954_s28, %s1301_s24 }
  0x5c   : > { %1045 = vmatprep.subr.bf16.mxu0 %v1152_v2  ;;  %1075 = vmatprep.subr.bf16.mxu1 %v1152_v2  ;;  %p1304_p13 = scmp.lt.s32.totalorder %s1302_s26, %s1296_s13 }
  0x5d   : > { %p1298_p6 = pnand %p1297_p4, %p1499_p12 }
  0x5e   : > { %p1305_p3 = por %p1304_p13, %p1303_p10 }
  0x5f   : > { %1046 = vmatpush3.bf16.msra.mxu0 %v1152_v2  ;;  %1083 = vmatpush3.bf16.msra.mxu1 %v1152_v2  ;;  %p1299_p8 = pneg %p1298_p6 }
  0x60   : > { %1047 = vmatprep.subr.bf16.mxu0 %v1153_v3  ;;  %1076 = vmatprep.subr.bf16.mxu1 %v1153_v3 }
  0x61   : > { %p1306_p7 = pnand %p1305_p3, %p1299_p8 }
  0x63   : > { %1048 = vmatpush3.bf16.msra.mxu0 %v1153_v3  ;;  %1084 = vmatpush3.bf16.msra.mxu1 %v1153_v3 }
  0x64   : > { %1049 = vmatprep.subr.bf16.mxu0 %v1154_v6  ;;  %1077 = vmatprep.subr.bf16.mxu1 %v1154_v6 }
  0x67   : > { %1050 = vmatpush3.bf16.msra.mxu0 %v1154_v6  ;;  %1085 = vmatpush3.bf16.msra.mxu1 %v1154_v6 }
  0x68   : > { %1051 = vmatprep.subr.bf16.mxu0 %v1155_v7  ;;  %1078 = vmatprep.subr.bf16.mxu1 %v1155_v7 }
  0x6b   : > { %1052 = vmatpush3.bf16.msra.mxu0 %v1155_v7  ;;  %1086 = vmatpush3.bf16.msra.mxu1 %v1155_v7 }
  0x6c   : > { %1053 = vmatprep.subr.bf16.mxu0 %v1156_v8  ;;  %1079 = vmatprep.subr.bf16.mxu1 %v1156_v8 }
  0x6f   : > { %1054 = vmatpush3.bf16.msra.mxu0 %v1156_v8  ;;  %1087 = vmatpush3.bf16.msra.mxu1 %v1156_v8 }
  0x70   : > { %1055 = vmatprep.subr.bf16.mxu0 %v1157_v9  ;;  %1080 = vmatprep.subr.bf16.mxu1 %v1157_v9 }
  0x73   : > { %1056 = vmatpush3.bf16.msra.mxu0 %v1157_v9  ;;  %1088 = vmatpush3.bf16.msra.mxu1 %v1157_v9 }
  0x76   : > { %1058 = vmatmul.mubr.bf16.vlgmr.msra.gmra.mrb[0].mxu0 %v1573_v10  ;;  %1066 = vmatmul.mubr.bf16.vlgmr.msra.gmra.mrb[0].mxu1 %v1576_v11 }
  0x77   : > { %1061 = vmatprep.mubr.bf16.mxu0 %v1579_v12  ;;  %1069 = vmatprep.mubr.bf16.mxu1 %v1582_v13 }
  0x7e   : > { %1062 = vmatmul.mubr.bf16.gmra.mrb[4].mxu0 %v1588_v14  ;;  %1070 = vmatmul.mubr.bf16.gmra.mrb[4].mxu1 %v1592_v15 }
 0x149   : > { %v1059_v17 = vpop.f32.mrb[0].mxu0  ;;  %v1067_v18 = vpop.f32.mrb[0].mxu1 }
 0x14a   : > { %v439_v19 = vadd.f32 %v1059_v17, %v999_v16  ;;  %v471_v20 = vadd.f32 %v1067_v18, %v999_v16  ;;  %v430_v21 = vpop.f32.mrb[1].mxu0  ;;  %v462_v22 = vpop.f32.mrb[1].mxu1 }
 0x14b   : > { %v1060_v23 = vpop.f32.mrb[2].mxu0  ;;  %v1068_v24 = vpop.f32.mrb[2].mxu1  ;;  %v431_v27 = vadd.f32 %v999_v16, %v430_v21  ;;  %v463_v31 = vadd.f32 %v999_v16, %v462_v22 }
 0x14c   : > { %531 = vadd.xlane.f32.xlu0 %v471_v20  ;;  %v465_v25 = vpop.f32.mrb[3].mxu1  ;;  %515 = vadd.xlane.f32.xlu1 %v439_v19  ;;  %v433_v26 = vpop.f32.mrb[3].mxu0  ;;  %v442_v28 = vadd.f32 %v1060_v23, %v999_v16  ;;  %v474_v32 = vadd.f32 %v1068_v24, %v999_v16 }
 0x14d   : > { %v466_v39 = vadd.f32 %v999_v16, %v465_v25  ;;  %v434_v40 = vadd.f32 %v999_v16, %v433_v26 }
 0x150   : > { %517 = vadd.xlane.f32.xlu1 %v442_v28  ;;  %511 = vadd.xlane.f32.xlu0 %v431_v27 }
 0x151   : > { %v1063_v29 = vpop.f32.mrb[4].mxu0  ;;  %v1071_v30 = vpop.f32.mrb[4].mxu1 }
 0x152   : > { %v446_v33 = vpop.f32.mrb[5].mxu0  ;;  %v478_v34 = vpop.f32.mrb[5].mxu1  ;;  %v455_v41 = vadd.f32 %v1063_v29, %v999_v16  ;;  %v1608_v47 = vadd.f32 %v1071_v30, %v999_v16 }
 0x153   : > { %v1064_v35 = vpop.f32.mrb[6].mxu0  ;;  %v1072_v36 = vpop.f32.mrb[6].mxu1  ;;  %v447_v43 = vadd.f32 %v999_v16, %v446_v33  ;;  %v1601_v45 = vadd.f32 %v999_v16, %v478_v34 }
 0x154   : > { %533 = vadd.xlane.f32.xlu1 %v474_v32  ;;  %527 = vadd.xlane.f32.xlu0 %v463_v31  ;;  %v449_v37 = vpop.f32.mrb[7].mxu0  ;;  %v481_v38 = vpop.f32.mrb[7].mxu1  ;;  %v458_v42 = vadd.f32 %v1064_v35, %v999_v16  ;;  %v1610_v48 = vadd.f32 %v1072_v36, %v999_v16 }
 0x155   : > { %v1599_v44 = vadd.f32 %v999_v16, %v449_v37  ;;  %v1604_v46 = vadd.f32 %v999_v16, %v481_v38 }
 0x158   : > { %529 = vadd.xlane.f32.xlu1 %v466_v39  ;;  %513 = vadd.xlane.f32.xlu0 %v434_v40 }
 0x15c   : > { %525 = vadd.xlane.f32.xlu1 %v458_v42  ;;  %523 = vadd.xlane.f32.xlu0 %v455_v41 }
 0x160   : > { %521 = vadd.xlane.f32.xlu1 %v1599_v44  ;;  %519 = vadd.xlane.f32.xlu0 %v447_v43 }
 0x164   : > { %537 = vadd.xlane.f32.xlu1 %v1604_v46  ;;  %535 = vadd.xlane.f32.xlu0 %v1601_v45 }
 0x168   : > { %541 = vadd.xlane.f32.xlu1 %v1610_v48  ;;  %539 = vadd.xlane.f32.xlu0 %v1608_v47 }
 0x1d9   : > { %v532_v49 = vpop.xlane.xlu0 %531  ;;  %v516_v50 = vpop.xlane.xlu1 %515 }
 0x1da   : > { %v553_v51 = vmul.f32 0.0078125, %v532_v49  ;;  %v545_v52 = vmul.f32 0.0078125, %v516_v50 }
 0x1dc   : > { %v1614_v53 = vsub.f32 %v439_v19, %v545_v52  ;;  %v1616_v56 = vsub.f32 %v471_v20, %v553_v51 }
 0x1dd   : > { %v518_v54 = vpop.xlane.xlu1 %517  ;;  %v512_v55 = vpop.xlane.xlu0 %511 }
 0x1de   : > { %v546_v57 = vmul.f32 0.0078125, %v518_v54  ;;  %v543_v58 = vmul.f32 0.0078125, %v512_v55  ;;  %v577_v59 = vmul.f32 %v1614_v53, %v1614_v53  ;;  %v585_v3 = vmul.f32 %v1616_v56, %v1616_v56 }
 0x1e0   : > { %v1620_v60 = vsub.f32 %v442_v28, %v546_v57  ;;  %595 = vadd.xlane.f32.xlu0 %v577_v59  ;;  %v1622_v61 = vsub.f32 %v431_v27, %v543_v58 }
 0x1e1   : > { %v534_v62 = vpop.xlane.xlu1 %533  ;;  %v528_v63 = vpop.xlane.xlu0 %527 }
 0x1e2   : > { %v554_v0 = vmul.f32 0.0078125, %v534_v62  ;;  %v551_v1 = vmul.f32 0.0078125, %v528_v63  ;;  %v578_v2 = vmul.f32 %v1620_v60, %v1620_v60  ;;  %v575_v9 = vmul.f32 %v1622_v61, %v1622_v61 }
 0x1e4   : > { %v1628_v6 = vsub.f32 %v474_v32, %v554_v0  ;;  %597 = vadd.xlane.f32.xlu1 %v578_v2  ;;  %611 = vadd.xlane.f32.xlu0 %v585_v3  ;;  %v1632_v16 = vsub.f32 %v463_v31, %v551_v1 }
 0x1e5   : > { %v530_v7 = vpop.xlane.xlu1 %529  ;;  %v514_v8 = vpop.xlane.xlu0 %513 }
 0x1e6   : > { %v552_v17 = vmul.f32 0.0078125, %v530_v7  ;;  %v544_v18 = vmul.f32 0.0078125, %v514_v8  ;;  %v586_v19 = vmul.f32 %v1628_v6, %v1628_v6  ;;  %v583_v26 = vmul.f32 %v1632_v16, %v1632_v16 }
 0x1e8   : > { %v1636_v20 = vsub.f32 %v434_v40, %v544_v18  ;;  %613 = vadd.xlane.f32.xlu1 %v586_v19  ;;  %591 = vadd.xlane.f32.xlu0 %v575_v9  ;;  %v1638_v21 = vsub.f32 %v466_v39, %v552_v17  ;;  %v493_v17 = vunpack.c.l.bf16 %v1565_v4  ;;  %v494_v18 = vunpack.c.h.bf16 %v1565_v4 }
 0x1e9   : > { %v526_v22 = vpop.xlane.xlu1 %525  ;;  %v524_v23 = vpop.xlane.xlu0 %523  ;;  %v501_v19 = vunpack.c.l.bf16 %v1568_v5 }
 0x1ea   : > { %v550_v24 = vmul.f32 0.0078125, %v526_v22  ;;  %v549_v25 = vmul.f32 0.0078125, %v524_v23  ;;  %v576_v27 = vmul.f32 %v1636_v20, %v1636_v20  ;;  %v584_v31 = vmul.f32 %v1638_v21, %v1638_v21 }
 0x1eb   : > { %v502_v22 = vunpack.c.h.bf16 %v1568_v5  ;;  %v495_v23 = vunpack.c.l.bf16 %v1573_v10 }
 0x1ec   : > { %v1644_v28 = vsub.f32 %v455_v41, %v549_v25  ;;  %607 = vadd.xlane.f32.xlu0 %v583_v26  ;;  %593 = vadd.xlane.f32.xlu1 %v576_v27  ;;  %v1648_v32 = vsub.f32 %v458_v42, %v550_v24  ;;  %v496_v24 = vunpack.c.h.bf16 %v1573_v10  ;;  %v503_v25 = vunpack.c.l.bf16 %v1576_v11 }
 0x1ed   : > { %v522_v29 = vpop.xlane.xlu1 %521  ;;  %v520_v30 = vpop.xlane.xlu0 %519  ;;  %v504_v26 = vunpack.c.h.bf16 %v1576_v11  ;;  %v499_v27 = vunpack.c.l.bf16 %v1588_v14 }
 0x1ee   : > { %v548_v33 = vmul.f32 0.0078125, %v522_v29  ;;  %v547_v34 = vmul.f32 0.0078125, %v520_v30  ;;  %v581_v35 = vmul.f32 %v1644_v28, %v1644_v28  ;;  %v582_v42 = vmul.f32 %v1648_v32, %v1648_v32 }
 0x1f0   : > { %v1652_v36 = vsub.f32 %v447_v43, %v547_v34  ;;  %609 = vadd.xlane.f32.xlu1 %v584_v31  ;;  %603 = vadd.xlane.f32.xlu0 %v581_v35  ;;  %v1655_v37 = vsub.f32 %v1599_v44, %v548_v33 }
 0x1f1   : > { %v538_v38 = vpop.xlane.xlu1 %537  ;;  %v536_v39 = vpop.xlane.xlu0 %535 }
 0x1f2   : > { %v556_v40 = vmul.f32 0.0078125, %v538_v38  ;;  %v555_v41 = vmul.f32 0.0078125, %v536_v39  ;;  %v579_v49 = vmul.f32 %v1652_v36, %v1652_v36  ;;  %v580_v44 = vmul.f32 %v1655_v37, %v1655_v37 }
 0x1f4   : > { %v1662_v50 = vsub.f32 %v1601_v45, %v555_v41  ;;  %605 = vadd.xlane.f32.xlu1 %v582_v42  ;;  %599 = vadd.xlane.f32.xlu0 %v579_v49  ;;  %v1667_v52 = vsub.f32 %v1604_v46, %v556_v40 }
 0x1f5   : > { %v542_v43 = vpop.xlane.xlu1 %541  ;;  %v540_v51 = vpop.xlane.xlu0 %539 }
 0x1f6   : > { %v558_v54 = vmul.f32 0.0078125, %v542_v43  ;;  %v557_v55 = vmul.f32 0.0078125, %v540_v51  ;;  %v587_v57 = vmul.f32 %v1662_v50, %v1662_v50  ;;  %v588_v59 = vmul.f32 %v1667_v52, %v1667_v52 }
 0x1f8   : > { %v1672_v58 = vsub.f32 %v1608_v47, %v557_v55  ;;  %601 = vadd.xlane.f32.xlu1 %v580_v44  ;;  %615 = vadd.xlane.f32.xlu0 %v587_v57  ;;  %v1675_v45 = vsub.f32 %v1610_v48, %v558_v54 }
 0x1fa   : > { %v589_v46 = vmul.f32 %v1672_v58, %v1672_v58  ;;  %v590_v62 = vmul.f32 %v1675_v45, %v1675_v45 }
 0x1fc   : > { %617 = vadd.xlane.f32.xlu1 %v588_v59  ;;  %619 = vadd.xlane.f32.xlu0 %v589_v46 }
 0x200   : > { %621 = vadd.xlane.f32.xlu1 %v590_v62 }
 0x26d   : > { %v596_v63 = vpop.xlane.xlu0 %595 }
 0x26e   : > { %v625_v47 = vmul.f32 0.007874016, %v596_v63 }
 0x270   : > { %1174 = vrsqrt.f32 %v625_v47  ;;  %vm655_vm0 = vcmp.eq.f32.partialorder %v625_v47, inf  ;;  %vm657_vm1 = vcmp.eq.f32.partialorder %v625_v47, 0.0  ;;  %v658_v38 = vand.u32 2147483648, %v625_v47 }
 0x271   : > { %v598_v0 = vpop.xlane.xlu1 %597  ;;  %v612_v1 = vpop.xlane.xlu0 %611 }
 0x272   : > { %v626_v2 = vmul.f32 0.007874016, %v598_v0  ;;  %v1683_v48 = vmul.f32 0.007874016, %v612_v1 }
 0x274   : > { %1176 = vrsqrt.f32 %v626_v2  ;;  %vm662_vm2 = vcmp.eq.f32.partialorder %v626_v2, inf  ;;  %vm664_vm3 = vcmp.eq.f32.partialorder %v626_v2, 0.0  ;;  %v665_v39 = vand.u32 2147483648, %v626_v2 }
 0x275   : > { %1178 = vrsqrt.f32 %v1683_v48  ;;  %v614_v3 = vpop.xlane.xlu1 %613  ;;  %v592_v7 = vpop.xlane.xlu0 %591  ;;  %vm711_vm4 = vcmp.eq.f32.partialorder %v1683_v48, inf  ;;  %vm713_vm5 = vcmp.eq.f32.partialorder %v1683_v48, 0.0  ;;  %v714_v41 = vand.u32 2147483648, %v1683_v48 }
 0x276   : > { %v1686_v8 = vmul.f32 0.007874016, %v614_v3  ;;  %v1688_v9 = vmul.f32 0.007874016, %v592_v7 }
 0x278   : > { %1180 = vrsqrt.f32 %v1686_v8  ;;  %vm718_vm6 = vcmp.eq.f32.partialorder %v1686_v8, inf  ;;  %vm720_vm7 = vcmp.eq.f32.partialorder %v1686_v8, 0.0  ;;  %v721_v46 = vand.u32 2147483648, %v1686_v8 }
 0x279   : > { %1182 = vrsqrt.f32 %v1688_v9  ;;  %v594_v29 = vpop.xlane.xlu1 %593  ;;  %v608_v30 = vpop.xlane.xlu0 %607  ;;  %vm641_vm8 = vcmp.eq.f32.partialorder %v1688_v9, inf  ;;  %vm643_vm9 = vcmp.eq.f32.partialorder %v1688_v9, 0.0  ;;  %v644_v63 = vand.u32 2147483648, %v1688_v9 }
 0x27a   : > { %v1175_v31 = vpop.eup %1174  ;;  %v1701_v33 = vmul.f32 0.007874016, %v594_v29  ;;  %v1703_v34 = vmul.f32 0.007874016, %v608_v30 }
 0x27b   : > { %v654_v35 = vmul.f32 %v1175_v31, %v625_v47 }
 0x27c   : > { %1184 = vrsqrt.f32 %v1701_v33  ;;  %vm648_vm10 = vcmp.eq.f32.partialorder %v1701_v33, inf  ;;  %vm650_vm11 = vcmp.eq.f32.partialorder %v1701_v33, 0.0  ;;  %v651_v29 = vand.u32 2147483648, %v1701_v33 }
 0x27d   : > { %v656_v40 = vsel %vm655_vm0, %v625_v47, %v654_v35  ;;  %1186 = vrsqrt.f32 %v1703_v34  ;;  %v610_v42 = vpop.xlane.xlu1 %609  ;;  %v604_v49 = vpop.xlane.xlu0 %603  ;;  %vm697_vm12 = vcmp.eq.f32.partialorder %v1703_v34, inf  ;;  %vm699_vm13 = vcmp.eq.f32.partialorder %v1703_v34, 0.0 }
 0x27e   : > { %v1177_v43 = vpop.eup %1176  ;;  %v659_v51 = vsel %vm657_vm1, %v658_v38, %v656_v40  ;;  %v1713_v44 = vmul.f32 0.007874016, %v610_v42  ;;  %v1715_v54 = vmul.f32 0.007874016, %v604_v49 }
 0x27f   : > { %v1179_v55 = vpop.eup %1178  ;;  %v753_v57 = vadd.f32 1e-06, %v659_v51  ;;  %v661_v59 = vmul.f32 %v1177_v43, %v626_v2 }
 0x280   : > { %v710_v62 = vmul.f32 %v1179_v55, %v1683_v48  ;;  %1188 = vrsqrt.f32 %v1713_v44  ;;  %vm704_vm14 = vcmp.eq.f32.partialorder %v1713_v44, inf  ;;  %vm706_vm15 = vcmp.eq.f32.partialorder %v1713_v44, 0.0 }
 0x281   : > { %1190 = vrcp.f32 %v753_v57  ;;  %v663_v47 = vsel %vm662_vm2, %v626_v2, %v661_v59  ;;  %v606_v0 = vpop.xlane.xlu1 %605  ;;  %v600_v40 = vpop.xlane.xlu0 %599  ;;  %vm683_vm0 = vcmp.eq.f32.partialorder %v1715_v54, inf  ;;  %vm685_vm1 = vcmp.eq.f32.partialorder %v1715_v54, 0.0 }
 0x282   : > { %v1181_v1 = vpop.eup %1180  ;;  %v666_v3 = vsel %vm664_vm3, %v665_v39, %v663_v47  ;;  %v712_v7 = vsel %vm711_vm4, %v1683_v48, %v710_v62  ;;  %1192 = vrsqrt.f32 %v1715_v54  ;;  %v1738_v42 = vmul.f32 0.007874016, %v606_v0 }
 0x283   : > { %v1183_v30 = vpop.eup %1182  ;;  %v754_v31 = vadd.f32 1e-06, %v666_v3  ;;  %v715_v35 = vsel %vm713_vm5, %v714_v41, %v712_v7  ;;  %v717_v38 = vmul.f32 %v1181_v1, %v1686_v8  ;;  %v700_v48 = vand.u32 2147483648, %v1703_v34 }
 0x284   : > { %v761_v2 = vadd.f32 1e-06, %v715_v35  ;;  %v640_v39 = vmul.f32 %v1183_v30, %v1688_v9  ;;  %v1750_v55 = vmul.f32 0.007874016, %v600_v40  ;;  %v686_v30 = vand.u32 2147483648, %v1715_v54 }
 0x285   : > { %1194 = vrcp.f32 %v754_v31  ;;  %v719_v49 = vsel %vm718_vm6, %v1686_v8, %v717_v38  ;;  %v602_v0 = vpop.xlane.xlu1 %601  ;;  %v1773_v35 = vld [vmem:[%s2003_s3] ss:$0 sm:$0xff]  ;;  %vm690_vm2 = vcmp.eq.f32.partialorder %v1738_v42, inf  ;;  %vm692_vm3 = vcmp.eq.f32.partialorder %v1738_v42, 0.0 }
 0x286   : > { %v1185_v41 = vpop.eup %1184  ;;  %1196 = vrcp.f32 %v761_v2  ;;  %v722_v43 = vsel %vm720_vm7, %v721_v46, %v719_v49  ;;  %v642_v51 = vsel %vm641_vm8, %v1688_v9, %v640_v39  ;;  %v707_v46 = vand.u32 2147483648, %v1713_v44 }
 0x287   : > { %v1187_v57 = vpop.eup %1186  ;;  %v762_v59 = vadd.f32 1e-06, %v722_v43  ;;  %v645_v62 = vsel %vm643_vm9, %v644_v63, %v642_v51  ;;  %v647_v47 = vmul.f32 %v1185_v41, %v1701_v33  ;;  %1198 = vrsqrt.f32 %v1738_v42 }
 0x288   : > { %v751_v1 = vadd.f32 1e-06, %v645_v62  ;;  %v696_v8 = vmul.f32 %v1187_v57, %v1703_v34  ;;  %v1782_v41 = vmul.f32 0.007874016, %v602_v0  ;;  %v693_v43 = vand.u32 2147483648, %v1738_v42 }
 0x289   : > { %1200 = vrcp.f32 %v762_v59  ;;  %v649_v3 = vsel %vm648_vm10, %v1701_v33, %v647_v47  ;;  %v618_v51 = vpop.xlane.xlu1 %617  ;;  %v1798_v47 = vld [vmem:[%s2004_s4] ss:$0 sm:$0xff]  ;;  %vm669_vm4 = vcmp.eq.f32.partialorder %v1750_v55, inf  ;;  %vm671_vm5 = vcmp.eq.f32.partialorder %v1750_v55, 0.0 }
 0x28a   : > { %v1189_v9 = vpop.eup %1188  ;;  %1202 = vrcp.f32 %v751_v1  ;;  %v652_v63 = vsel %vm650_vm11, %v651_v29, %v649_v3  ;;  %v698_v7 = vsel %vm697_vm12, %v1703_v34, %v696_v8  ;;  %v616_v29 = vpop.xlane.xlu0 %615  ;;  %vm676_vm6 = vcmp.eq.f32.partialorder %v1782_v41, inf }
 0x28b   : > { %v1191_v31 = vpop.eup %1190  ;;  %v752_v38 = vadd.f32 1e-06, %v652_v63  ;;  %v701_v40 = vsel %vm699_vm13, %v700_v48, %v698_v7  ;;  %v703_v33 = vmul.f32 %v1189_v9, %v1713_v44  ;;  %1204 = vrsqrt.f32 %v1750_v55 }
 0x28c   : > { %v1193_v2 = vpop.eup %1192  ;;  %v801_v39 = vmul.f32 %v1191_v31, %v1614_v53  ;;  %v759_v49 = vadd.f32 1e-06, %v701_v40  ;;  %v1793_v59 = vmul.f32 0.007874016, %v616_v29  ;;  %v1810_v9 = vmul.f32 0.007874016, %v618_v51 }
 0x28d   : > { %1206 = vrcp.f32 %v752_v38  ;;  %v705_v34 = vsel %vm704_vm14, %v1713_v44, %v703_v33  ;;  %v682_v48 = vmul.f32 %v1193_v2, %v1715_v54  ;;  %vm678_vm7 = vcmp.eq.f32.partialorder %v1782_v41, 0.0 }
 0x28e   : > { %v823_v57 = vmul.f32 %v1773_v35, %v801_v39  ;;  %1208 = vrcp.f32 %v759_v49  ;;  %v708_v53 = vsel %vm706_vm15, %v707_v46, %v705_v34  ;;  %vm725_vm8 = vcmp.eq.f32.partialorder %v1793_v59, inf }
 0x28f   : > { %v1195_v62 = vpop.eup %1194  ;;  %v760_v0 = vadd.f32 1e-06, %v708_v53  ;;  %v684_v1 = vsel %vm683_vm0, %v1715_v54, %v682_v48  ;;  %1210 = vrsqrt.f32 %v1782_v41  ;;  %v620_v53 = vpop.xlane.xlu0 %619  ;;  %vm727_vm9 = vcmp.eq.f32.partialorder %v1793_v59, 0.0 }
 0x290   : > { %v1197_v8 = vpop.eup %1196  ;;  %v839_v44 = vadd.f32 %v823_v57, %v495_v23  ;;  %v802_v46 = vmul.f32 %v1195_v62, %v1620_v60  ;;  %v687_v3 = vsel %vm685_vm1, %v686_v30, %v684_v1  ;;  %v672_v30 = vand.u32 2147483648, %v1750_v55 }
 0x291   : > { %v1199_v63 = vpop.eup %1198  ;;  %v809_v7 = vmul.f32 %v1197_v8, %v1616_v56  ;;  %1212 = vrcp.f32 %v760_v0  ;;  %v757_v31 = vadd.f32 1e-06, %v687_v3  ;;  %v1860_v11 = vmul.f32 0.007874016, %v620_v53 }
 0x292   : > { %v861_v38 = vadd.f32 %v1798_v47, %v839_v44  ;;  %v824_v40 = vmul.f32 %v1773_v35, %v802_v46  ;;  %v689_v23 = vmul.f32 %v1199_v63, %v1738_v42  ;;  %1214 = vrsqrt.f32 %v1793_v59 }
 0x293   : > { %v1201_v60 = vpop.eup %1200  ;;  %v831_v54 = vmul.f32 %v1773_v35, %v809_v7  ;;  %1216 = vrcp.f32 %v757_v31  ;;  %vm732_vm10 = vcmp.eq.f32.partialorder %v1810_v9, inf  ;;  %vm734_vm11 = vcmp.eq.f32.partialorder %v1810_v9, 0.0 }
 0x294   : > { %v1203_v56 = vpop.eup %1202  ;;  %877 = vst [vmem:[%s1823_s15 + $0x10] sm:$0xff] %v861_v38  ;;  %v840_v33 = vadd.f32 %v824_v40, %v496_v24  ;;  %v810_v29 = vmul.f32 %v1201_v60, %v1628_v6  ;;  %v691_v2 = vsel %vm690_vm2, %v1738_v42, %v689_v23  ;;  %1218 = vrsqrt.f32 %v1810_v9 }
 0x295   : > { %v1205_v39 = vpop.eup %1204  ;;  %v847_v49 = vadd.f32 %v831_v54, %v503_v25  ;;  %v799_v34 = vmul.f32 %v1203_v56, %v1622_v61  ;;  %v694_v10 = vsel %vm692_vm3, %v693_v43, %v691_v2  ;;  %v679_v6 = vand.u32 2147483648, %v1782_v41 }
 0x296   : > { %v862_v24 = vadd.f32 %v1798_v47, %v840_v33  ;;  %v832_v48 = vmul.f32 %v1773_v35, %v810_v29  ;;  %v758_v51 = vadd.f32 1e-06, %v694_v10  ;;  %v668_v57 = vmul.f32 %v1205_v39, %v1750_v55  ;;  %v622_v39 = vpop.xlane.xlu1 %621 }
 0x297   : > { %v1207_v62 = vpop.eup %1206  ;;  %v869_v0 = vadd.f32 %v1798_v47, %v847_v49  ;;  %v821_v25 = vmul.f32 %v1773_v35, %v799_v34  ;;  %v735_v34 = vand.u32 2147483648, %v1810_v9  ;;  %vm739_vm12 = vcmp.eq.f32.partialorder %v1860_v11, inf }
 0x298   : > { %v1209_v61 = vpop.eup %1208  ;;  %878 = vst [vmem:[%s1823_s15 + $0x18] sm:$0xff] %v862_v24  ;;  %v848_v42 = vadd.f32 %v832_v48, %v504_v26  ;;  %v800_v43 = vmul.f32 %v1207_v62, %v1636_v20  ;;  %1220 = vrcp.f32 %v758_v51  ;;  %v670_v1 = vsel %vm669_vm4, %v1750_v55, %v668_v57 }
 0x299   : > { %v1211_v8 = vpop.eup %1210  ;;  %885 = vst [vmem:[%s1823_s15 + $0x50] sm:$0xff] %v869_v0  ;;  %v837_v44 = vadd.f32 %v821_v25, %v493_v17  ;;  %v807_v46 = vmul.f32 %v1209_v61, %v1632_v16  ;;  %v673_v3 = vsel %vm671_vm5, %v672_v30, %v670_v1  ;;  %v728_v16 = vand.u32 2147483648, %v1793_v59 }
 0x29a   : > { %v870_v20 = vadd.f32 %v1798_v47, %v848_v42  ;;  %v822_v26 = vmul.f32 %v1773_v35, %v800_v43  ;;  %v755_v63 = vadd.f32 1e-06, %v673_v3  ;;  %v675_v7 = vmul.f32 %v1211_v8, %v1782_v41 }
 0x29b   : > { %v1213_v31 = vpop.eup %1212  ;;  %v859_v38 = vadd.f32 %v1798_v47, %v837_v44  ;;  %v829_v17 = vmul.f32 %v1773_v35, %v807_v46  ;;  %1222 = vrsqrt.f32 %v1860_v11  ;;  %v638_v51 = vmul.f32 0.007874016, %v622_v39 }
 0x29c   : > { %v1215_v55 = vpop.eup %1214  ;;  %886 = vst [vmem:[%s1823_s15 + $0x58] sm:$0xff] %v870_v20  ;;  %v838_v40 = vadd.f32 %v822_v26, %v494_v18  ;;  %v808_v23 = vmul.f32 %v1213_v31, %v1638_v21  ;;  %1224 = vrcp.f32 %v755_v63  ;;  %v677_v60 = vsel %vm676_vm6, %v1782_v41, %v675_v7 }
 0x29d   : > { %v1217_v54 = vpop.eup %1216  ;;  %875 = vst [vmem:[%s1823_s15] sm:$0xff] %v859_v38  ;;  %v845_v30 = vadd.f32 %v829_v17, %v501_v19  ;;  %v680_v56 = vsel %vm678_vm7, %v679_v6, %v677_v60  ;;  %v724_v33 = vmul.f32 %v1215_v55, %v1793_v59  ;;  %v497_v43 = vunpack.c.l.bf16 %v1579_v12 }
 0x29e   : > { %v1219_v4 = vpop.eup %1218  ;;  %v860_v21 = vadd.f32 %v1798_v47, %v838_v40  ;;  %v830_v18 = vmul.f32 %v1773_v35, %v808_v23  ;;  %v805_v29 = vmul.f32 %v1217_v54, %v1644_v28  ;;  %v756_v2 = vadd.f32 1e-06, %v680_v56 }
 0x29f   : > { %v867_v49 = vadd.f32 %v1798_v47, %v845_v30  ;;  %v726_v19 = vsel %vm725_vm8, %v1793_v59, %v724_v33  ;;  %v731_v41 = vmul.f32 %v1219_v4, %v1810_v9  ;;  %v500_v59 = vunpack.c.h.bf16 %v1588_v14 }
 0x2a0   : > { %876 = vst [vmem:[%s1823_s15 + $0x8] sm:$0xff] %v860_v21  ;;  %v846_v10 = vadd.f32 %v830_v18, %v502_v22  ;;  %v827_v6 = vmul.f32 %v1773_v35, %v805_v29  ;;  %1226 = vrcp.f32 %v756_v2  ;;  %v729_v28 = vsel %vm727_vm9, %v728_v16, %v726_v19 }
 0x2a1   : > { %883 = vst [vmem:[%s1823_s15 + $0x40] sm:$0xff] %v867_v49  ;;  %v763_v24 = vadd.f32 1e-06, %v729_v28  ;;  %v733_v48 = vsel %vm732_vm10, %v1810_v9, %v731_v41  ;;  %v742_v1 = vand.u32 2147483648, %v1860_v11  ;;  %vm741_vm13 = vcmp.eq.f32.partialorder %v1860_v11, 0.0 }
 0x2a2   : > { %v1221_v57 = vpop.eup %1220  ;;  %v868_v5 = vadd.f32 %v1798_v47, %v846_v10  ;;  %v843_v22 = vadd.f32 %v827_v6, %v499_v27  ;;  %v736_v53 = vsel %vm734_vm11, %v735_v34, %v733_v48  ;;  %v498_v63 = vunpack.c.h.bf16 %v1579_v12 }
 0x2a3   : > { %v806_v62 = vmul.f32 %v1221_v57, %v1648_v32  ;;  %1228 = vrcp.f32 %v763_v24  ;;  %v764_v0 = vadd.f32 1e-06, %v736_v53  ;;  %v505_v16 = vunpack.c.l.bf16 %v1582_v13 }
 0x2a4   : > { %884 = vst [vmem:[%s1823_s15 + $0x48] sm:$0xff] %v868_v5  ;;  %v865_v25 = vadd.f32 %v1798_v47, %v843_v22  ;;  %1230 = vrsqrt.f32 %v638_v51  ;;  %v506_v23 = vunpack.c.h.bf16 %v1582_v13  ;;  %vm746_vm14 = vcmp.eq.f32.partialorder %v638_v51, inf }
 0x2a5   : > { %v1223_v9 = vpop.eup %1222  ;;  %v828_v61 = vmul.f32 %v1773_v35, %v806_v62  ;;  %1232 = vrcp.f32 %v764_v0  ;;  %v749_v30 = vand.u32 2147483648, %v638_v51  ;;  %vm748_vm15 = vcmp.eq.f32.partialorder %v638_v51, 0.0 }
 0x2a6   : > { %v1225_v42 = vpop.eup %1224  ;;  %881 = vst [vmem:[%s1823_s15 + $0x30] sm:$0xff] %v865_v25  ;;  %v738_v27 = vmul.f32 %v1223_v9, %v1860_v11  ;;  %v507_v39 = vunpack.c.l.bf16 %v1592_v15  ;;  %v508_v6 = vunpack.c.h.bf16 %v1592_v15 }
 0x2a7   : > { %v844_v14 = vadd.f32 %v828_v61, %v500_v59  ;;  %v803_v32 = vmul.f32 %v1225_v42, %v1652_v36 }
 0x2a8   : > { %v740_v8 = vsel %vm739_vm12, %v1860_v11, %v738_v27 }
 0x2a9   : > { %v866_v44 = vadd.f32 %v1798_v47, %v844_v14  ;;  %v825_v46 = vmul.f32 %v1773_v35, %v803_v32  ;;  %v743_v3 = vsel %vm741_vm13, %v742_v1, %v740_v8 }
 0x2aa   : > { %v1227_v20 = vpop.eup %1226  ;;  %v765_v26 = vadd.f32 1e-06, %v743_v3 }
 0x2ab   : > { %882 = vst [vmem:[%s1823_s15 + $0x38] sm:$0xff] %v866_v44  ;;  %v841_v36 = vadd.f32 %v825_v46, %v497_v43  ;;  %v804_v7 = vmul.f32 %v1227_v20, %v1655_v37 }
 0x2ac   : > { %1234 = vrcp.f32 %v765_v26 }
 0x2ad   : > { %v1229_v31 = vpop.eup %1228  ;;  %v863_v38 = vadd.f32 %v1798_v47, %v841_v36  ;;  %v826_v11 = vmul.f32 %v1773_v35, %v804_v7 }
 0x2ae   : > { %v1231_v17 = vpop.eup %1230  ;;  %v811_v55 = vmul.f32 %v1229_v31, %v1662_v50 }
 0x2af   : > { %v1233_v40 = vpop.eup %1232  ;;  %879 = vst [vmem:[%s1823_s15 + $0x20] sm:$0xff] %v863_v38  ;;  %v842_v12 = vadd.f32 %v826_v11, %v498_v63  ;;  %v745_v60 = vmul.f32 %v1231_v17, %v638_v51 }
 0x2b0   : > { %v833_v37 = vmul.f32 %v1773_v35, %v811_v55  ;;  %v812_v54 = vmul.f32 %v1233_v40, %v1667_v52 }
 0x2b1   : > { %v864_v56 = vadd.f32 %v1798_v47, %v842_v12  ;;  %v747_v33 = vsel %vm746_vm14, %v638_v51, %v745_v60 }
 0x2b2   : > { %v849_v50 = vadd.f32 %v833_v37, %v505_v16  ;;  %v834_v4 = vmul.f32 %v1773_v35, %v812_v54  ;;  %v750_v21 = vsel %vm748_vm15, %v749_v30, %v747_v33 }
 0x2b3   : > { %880 = vst [vmem:[%s1823_s15 + $0x28] sm:$0xff] %v864_v56  ;;  %v766_v13 = vadd.f32 1e-06, %v750_v21 }
 0x2b4   : > { %v871_v18 = vadd.f32 %v1798_v47, %v849_v50  ;;  %v850_v29 = vadd.f32 %v834_v4, %v506_v23 }
 0x2b5   : > { %1236 = vrcp.f32 %v766_v13 }
 0x2b6   : > { %v1235_v52 = vpop.eup %1234  ;;  %887 = vst [vmem:[%s1823_s15 + $0x60] sm:$0xff] %v871_v18  ;;  %v872_v2 = vadd.f32 %v1798_v47, %v850_v29 }
 0x2b7   : > { %v813_v49 = vmul.f32 %v1235_v52, %v1672_v58 }
 0x2b8   : > { %888 = vst [vmem:[%s1823_s15 + $0x68] sm:$0xff] %v872_v2 }
 0x2b9   : > { %v835_v19 = vmul.f32 %v1773_v35, %v813_v49 }
 0x2bb   : > { %v851_v41 = vadd.f32 %v835_v19, %v507_v39 }
 0x2bd   : > { %v873_v34 = vadd.f32 %v1798_v47, %v851_v41 }
 0x2bf   : > { %v1237_v10 = vpop.eup %1236  ;;  %889 = vst [vmem:[%s1823_s15 + $0x70] sm:$0xff] %v873_v34 }
 0x2c0   : > { %v814_v28 = vmul.f32 %v1237_v10, %v1675_v45 }
 0x2c2   : > { %v836_v24 = vmul.f32 %v1773_v35, %v814_v28 }
 0x2c4   : > { %v852_v58 = vadd.f32 %v836_v24, %v508_v6 }
 0x2c6   : > { %v874_v48 = vadd.f32 %v1798_v47, %v852_v58 }
 0x2c8   : > { %890 = vst [vmem:[%s1823_s15 + $0x78] sm:$0xff] %v874_v48 }
 0x2c9   : > { %1309 = shalt.err (!%p1306_p7)
}
 0x2ca   : > { %s1310_s16 = scalar_lea.hbm %s1952_s11, 2048  ;;  %s1314_s6 = scalar_lea.hbm %s2005_s5, 4096 }
 0x2cb   : > { %p1311_p9 = scmp.ne.s32.totalorder %s1952_s11, %s1310_s16  ;;  %p1315_p5 = scmp.lt.u32.totalorder %s1952_s11, %s2005_s5 }
 0x2cc   : > { %p1316_p11 = scmp.lt.u32.totalorder %s1314_s6, %s1310_s16  ;;  %p1318_p4 = scmp.lt.u32.totalorder %s1310_s16, %s1952_s11 }
 0x2cd   : > { %p1312_p1 = pnand %p1311_p9, %p1499_p12 }
 0x2ce   : > { %p1317_p2 = por %p1316_p11, %p1315_p5 }
 0x2cf   : > { %p1313_p0 = pneg %p1312_p1 }
 0x2d0   : > { %p1319_p6 = por %p1318_p4, %p1317_p2 }
 0x2d2   : > { %p1320_p8 = pnand %p1319_p6, %p1313_p0 }
 0x2d4   : > { %1323 = shalt.err (!%p1320_p8)
}
 0x2d5   : > { %s1373_s29 = smov 128   ;;  %s1374_s27 = smov 8  }
 0x2d6   : > { %1095 = dma.vmem_to_hbm [thread:$0]  (%p1499_p12), %s1954_s28, 2048, %s1952_s11, %s892_s12, %s1373_s29, %s1373_s29, %s1374_s27  }
 0x2d7 PF: > { %s920_s10 = sand.u32 1, %s1354_s18   ;;  %p2020_p10 = scmp.ne.s32.totalorder %s2010_s25, 0 }
 0x2d8   : > { %p2021_p13 = scmp.ge.s32.totalorder %s1366_s21, 2  ;;  %s921_s13 = scalar_lea.sflag [#allocation4], %s920_s10 }
 0x2da   : > { %p1106_p3 = pnand %p2021_p13, %p2020_p10 }
 0x2dc   : > { %1349 = dma.done.wait (!%p1106_p3), %s921_s13, 2048  }
 0x2dd   : > { %1351 = vsyncadd (!%p1106_p3), %s921_s13, 4294965248  ;;  %p19_p7 = scmp.ge.s32.totalorder %s1461_s30, 4   ;;  %s2022_s18 = smov %s1358_s19 }
 0x2de   : > { %s2023_s19 = smov %s1362_s20  ;;  %s2024_s20 = smov %s1495_s8 }
 0x2df   : > { %s2025_s21 = smov %s1461_s30  ;;  %21 = sbr.rel (!%p19_p7) target bundleno = 6 (0x6), region = 89 }
 0x2e6   :  { %926 = vsyncpa [#allocation3], 1 }
 0x2e7   :  { %928 = vsyncpa [#allocation3 + $0x1], 1 }
 0x2e8   :  { %929 = vsyncpa [#allocation6], 1 }
 0x2e9   :  { %930 = vsyncpa [#allocation4], 1 }
 0x2ea   :  { %932 = vsyncpa [#allocation4 + $0x1], 1 }

</bundles_post_ra>
